<compile_context>
chip_gen: v7x
topology: tpu7x:2x2x1
jax: 0.10.0
libtpu: 0.0.40
codegen_flags: <defaults>
</compile_context>

<pallas_src>
import jax
import jax.numpy as jnp
import numpy as np
from jax.experimental import pallas as pl
from jax.experimental.pallas import tpu as pltpu

LANES = 128


def _round_up(n, m):
    return -(-n // m) * m


# ----------------------------------------------------------------------------
# Host-side packing: every parameter / constant goes into ONE (rows, 128) f32
# slab at 8-aligned sublane offsets -> a single weight DMA, static ref views.
# ----------------------------------------------------------------------------
def pack_params(p, B, T, num_features, hidden):
    H, BT = hidden, B * T
    B_pad = _round_up(B, 8)

    blocks, off = [], {}
    rows = 0

    def add(name, a):
        nonlocal rows
        a = np.asarray(a, np.float32)
        if a.ndim == 1:
            a = a.reshape(1, -1)
        r, c = a.shape
        assert c <= LANES
        rp = _round_up(r, 8)
        buf = np.zeros((rp, LANES), np.float32)
        buf[:r, :c] = a
        off[name] = (rows, r, c)          # (row offset, true rows, true cols)
        blocks.append(buf)
        rows += rp

    # conv taps, stored per-tap as (Cin, Cout); lanes zero-padded to 128.
    for k in range(3):
        add(f'c1w{k}', p['conv1_w'][k])
    add('c1b', p['conv1_b'])
    for k in range(3):
        add(f'c2w{k}', p['conv2_w'][k])
    add('c2b', p['conv2_b'])

    # Shift matrices implementing the +/-1 time taps of the pad=1 convs as
    # matmuls on the (B*T, C) activation slab; sequence-end zero padding and
    # batch boundaries are baked in as zero rows (no in-kernel masks/rolls).
    sprev = np.zeros((BT, BT), np.float32)
    snext = np.zeros((BT, BT), np.float32)
    for b in range(B):
        for t in range(T):
            r = b * T + t
            if t > 0:
                sprev[r, r - 1] = 1.0
            if t < T - 1:
                snext[r, r + 1] = 1.0
    add('sprev', sprev)
    add('snext', snext)

    # Global average pool as an (8, B*T) matmul with 1/T folded in; rows
    # B..7 are zero so the whole network tail runs on a full 8-sublane slab.
    pool = np.zeros((B_pad, BT), np.float32)
    for b in range(B):
        pool[b, b * T:(b + 1) * T] = 1.0 / T
    add('pool', pool)

    add('fc1w', p['fc1_w'])
    add('fc1b', p['fc1_b'])

    # LSTM (seq_len=1, zero initial state): forget gate and W_hh are inert,
    # b_ih+b_hh pre-folded.  Each gate gets its own 128-lane block with the
    # two directions side-by-side ([fwd | bwd | 0-pad]) so the bidirectional
    # output is born as [h_fwd | h_bwd] with no lane shuffles.
    def add_lstm(prefix, wf, bf, wb, bb):
        wf, bf, wb, bb = (np.asarray(a, np.float32) for a in (wf, bf, wb, bb))
        for gname, g in (('i', 0), ('g', 2), ('o', 3)):     # PyTorch [i,f,g,o]
            add(prefix + 'w' + gname,
                np.concatenate([wf[:, g * H:(g + 1) * H],
                                wb[:, g * H:(g + 1) * H]], axis=1))
            add(prefix + 'b' + gname,
                np.concatenate([bf[g * H:(g + 1) * H],
                                bb[g * H:(g + 1) * H]]))

    add_lstm('l1', p['l1f_w'], p['l1f_b'], p['l1b_w'], p['l1b_b'])
    add_lstm('l2', p['l2f_w'], p['l2f_b'], p['l2b_w'], p['l2b_b'])

    add('fc2w', p['fc2_w'])
    add('fc2b', p['fc2_b'])

    slab = jnp.asarray(np.concatenate(blocks, axis=0))
    return slab, off


# ----------------------------------------------------------------------------
# Fused forward kernel + wrapper (single grid-less pallas_call, 2 inputs)
# ----------------------------------------------------------------------------
def make_forward(off, B, T, num_features, hidden, num_classes, slab_rows):
    H2 = 2 * hidden
    BT = B * T
    B_pad = _round_up(B, 8)
    C1 = 64

    def kernel(x_ref, w_ref, o_ref):
        f32 = jnp.float32

        def full(name):                       # full 128 lanes (zero padded)
            o, r, _ = off[name]
            return w_ref[o:o + r, :]

        def narrow(name):                     # true lane width (prefix slice)
            o, r, c = off[name]
            return w_ref[o:o + r, :c]

        def mm(a, b):
            return jnp.dot(a, b, preferred_element_type=f32)

        sprev = narrow('sprev')               # (BT, BT)
        snext = narrow('snext')

        def conv_relu(h, cin, layer):
            # y[t] = x[t-1]@W0 + x[t]@W1 + x[t+1]@W2 + b, zero-padded ends.
            hc = h[:, :cin]
            t0 = mm(hc, full(layer + 'w0'))
            t1 = mm(hc, full(layer + 'w1'))
            t2 = mm(hc, full(layer + 'w2'))
            y = mm(sprev, t0) + t1 + mm(snext, t2) + full(layer + 'b')
            return jnp.maximum(y, 0.0)

        h1 = conv_relu(x_ref[...], num_features, 'c1')   # (BT,128), :64 valid
        h2 = conv_relu(h1, C1, 'c2')                     # (BT,128)

        pooled = mm(narrow('pool'), h2)                  # (8,128), rows :B valid
        f1 = jnp.maximum(mm(pooled, full('fc1w')) + full('fc1b'), 0.0)

        def bilstm(h, din, layer):
            # zero initial state: h_out = sig(o) * tanh(sig(i) * tanh(g))
            hc = h[:, :din]
            gi = mm(hc, full(layer + 'wi')) + full(layer + 'bi')
            gg = mm(hc, full(layer + 'wg')) + full(layer + 'bg')
            go = mm(hc, full(layer + 'wo')) + full(layer + 'bo')
            return jax.nn.sigmoid(go) * jnp.tanh(jax.nn.sigmoid(gi) * jnp.tanh(gg))

        l1h = bilstm(f1, hidden, 'l1')                   # (8,128), :2H valid
        l2h = bilstm(l1h, H2, 'l2')

        # TODO(synk): training-mode dropout not implemented (eval forward only).
        y = mm(l2h[:, :H2], full('fc2w')) + full('fc2b')
        o_ref[...] = y                                   # (8,128) lane/sublane dense

    conv_flops = 2 * BT * 3 * (num_features * 64 + 64 * 128) + 2 * 4 * BT * BT * 128
    tail_flops = 2 * B_pad * (BT * 128 + 128 * 128
                              + 3 * hidden * 128 + 3 * H2 * 128 + H2 * 128)
    vmem = pltpu.MemorySpace.VMEM
    call = pl.pallas_call(
        kernel,
        out_shape=jax.ShapeDtypeStruct((B_pad, LANES), jnp.float32),
        in_specs=[pl.BlockSpec(memory_space=vmem),
                  pl.BlockSpec(memory_space=vmem)],
        out_specs=pl.BlockSpec(memory_space=vmem),
        cost_estimate=pl.CostEstimate(
            flops=conv_flops + tail_flops,
            transcendentals=8 * B_pad * LANES,
            bytes_accessed=4 * (slab_rows * LANES + BT * num_features
                                + B_pad * LANES)),
    )

    @jax.jit
    def forward(x_ncl, w_slab):
        # NCL -> (B*T, F) slab: one tiny fused transpose+reshape HLO op.
        x_slab = jnp.transpose(x_ncl, (0, 2, 1)).reshape(BT, num_features)
        y = call(x_slab.astype(jnp.float32), w_slab)
        return y[:B, :num_classes]

    return forward


# ----------------------------------------------------------------------------
# Deterministic synthetic parameters (shapes follow the nn.Module __init__)
# ----------------------------------------------------------------------------
def init_params(key, num_features, num_classes, hidden):
    ks = jax.random.split(key, 16)

    def nrm(k, shape, scale=0.1):
        return scale * jax.random.normal(k, shape, jnp.float32)

    p = {}
    p['conv1_w'] = nrm(ks[0], (3, num_features, 64))     # (K, Cin, Cout)
    p['conv1_b'] = nrm(ks[1], (64,))
    p['conv2_w'] = nrm(ks[2], (3, 64, 128))
    p['conv2_b'] = nrm(ks[3], (128,))
    p['fc1_w'] = nrm(ks[4], (128, hidden))
    p['fc1_b'] = nrm(ks[5], (hidden,))
    # LSTM weights stored as (Din, 4H), gate order [i,f,g,o]; bias = b_ih+b_hh
    # (exact fold for the zero initial state / length-1 sequence).
    p['l1f_w'] = nrm(ks[6], (hidden, 4 * hidden))
    p['l1f_b'] = nrm(ks[7], (4 * hidden,))
    p['l1b_w'] = nrm(ks[8], (hidden, 4 * hidden))
    p['l1b_b'] = nrm(ks[9], (4 * hidden,))
    p['l2f_w'] = nrm(ks[10], (2 * hidden, 4 * hidden))
    p['l2f_b'] = nrm(ks[11], (4 * hidden,))
    p['l2b_w'] = nrm(ks[12], (2 * hidden, 4 * hidden))
    p['l2b_b'] = nrm(ks[13], (4 * hidden,))
    p['fc2_w'] = nrm(ks[14], (2 * hidden, num_classes))
    p['fc2_b'] = nrm(ks[15], (num_classes,))
    return p


# ----------------------------------------------------------------------------
# Pure-JAX reference (raw unpacked params) for the correctness assert
# ----------------------------------------------------------------------------
def reference_forward(x_ncl, p, hidden):
    hi = jax.lax.Precision.HIGHEST
    x = jnp.transpose(x_ncl, (0, 2, 1))

    def conv(x, w, b):
        T = x.shape[1]
        xp = jnp.pad(x, ((0, 0), (1, 1), (0, 0)))
        y = sum(jnp.einsum('btc,cd->btd', xp[:, k:k + T, :], w[k], precision=hi)
                for k in range(3)) + b
        return jnp.maximum(y, 0.0)

    h = conv(x, p['conv1_w'], p['conv1_b'])
    h = conv(h, p['conv2_w'], p['conv2_b'])
    f = jnp.maximum(
        jnp.dot(jnp.mean(h, axis=1), p['fc1_w'], precision=hi) + p['fc1_b'], 0.0)

    def lstm_dir(xx, w, b):
        g = jnp.dot(xx, w, precision=hi) + b
        i = jax.nn.sigmoid(g[:, :hidden])
        gg = jnp.tanh(g[:, 2 * hidden:3 * hidden])
        o = jax.nn.sigmoid(g[:, 3 * hidden:])
        return o * jnp.tanh(i * gg)

    l1 = jnp.concatenate([lstm_dir(f, p['l1f_w'], p['l1f_b']),
                          lstm_dir(f, p['l1b_w'], p['l1b_b'])], axis=-1)
    l2 = jnp.concatenate([lstm_dir(l1, p['l2f_w'], p['l2f_b']),
                          lstm_dir(l1, p['l2b_w'], p['l2b_b'])], axis=-1)
    return jnp.dot(l2, p['fc2_w'], precision=hi) + p['fc2_b']


if __name__ == "__main__":
    key = jax.random.PRNGKey(0)
    B, num_features, T = 2, 8, 16
    num_classes, hidden = 4, 32

    kx, kp = jax.random.split(key)
    x = jax.random.normal(kx, (B, num_features, T), jnp.float32)   # NCL input
    params = init_params(kp, num_features, num_classes, hidden)
    w_slab, off = pack_params(params, B, T, num_features, hidden)

    forward = make_forward(off, B, T, num_features, hidden, num_classes,
                           w_slab.shape[0])
    out = jax.block_until_ready(forward(x, w_slab))
    assert out.shape == (B, num_classes)

    ref = jax.block_until_ready(reference_forward(x, params, hidden))
    np.testing.assert_allclose(np.asarray(out), np.asarray(ref),
                               rtol=1e-3, atol=1e-3)
    print("KERNEL_OK")
</pallas_src>

<mosaic_0001>
module attributes {stable_mosaic.version = 11 : i64} {
  func.func @kernel(%arg0: memref<32x8xf32, #tpu.memory_space<vmem>>, %arg1: memref<848x128xf32, #tpu.memory_space<vmem>>, %arg2: memref<8x128xf32, #tpu.memory_space<vmem>>) attributes {dimension_semantics = [], scalar_prefetch = 0 : i64, scratch_operands = 0 : i64, tpu.core_type = #tpu.core_type<tc>} {
    %c232 = arith.constant 232 : index
    %c0 = arith.constant 0 : index
    %0 = vector.load %arg1[%c232, %c0] : memref<848x128xf32, #tpu.memory_space<vmem>>, vector<32x32xf32>
    %c264 = arith.constant 264 : index
    %c0_0 = arith.constant 0 : index
    %1 = vector.load %arg1[%c264, %c0_0] : memref<848x128xf32, #tpu.memory_space<vmem>>, vector<32x32xf32>
    %c0_1 = arith.constant 0 : index
    %c0_2 = arith.constant 0 : index
    %2 = vector.load %arg0[%c0_1, %c0_2] : memref<32x8xf32, #tpu.memory_space<vmem>>, vector<32x8xf32>
    %c0_3 = arith.constant 0 : index
    %c0_4 = arith.constant 0 : index
    %3 = vector.load %arg1[%c0_3, %c0_4] : memref<848x128xf32, #tpu.memory_space<vmem>>, vector<8x128xf32>
    %cst = arith.constant dense<0.000000e+00> : vector<32x128xf32>
    %4 = tpu.matmul %2, %3, %cst {dimension_numbers = #tpu.dot_dimension_numbers<[1], [0], [0], [1], [0, 0, 1, 1], [], []>} : vector<32x8xf32>, vector<8x128xf32>, vector<32x128xf32> -> vector<32x128xf32>
    %c8 = arith.constant 8 : index
    %c0_5 = arith.constant 0 : index
    %5 = vector.load %arg1[%c8, %c0_5] : memref<848x128xf32, #tpu.memory_space<vmem>>, vector<8x128xf32>
    %cst_6 = arith.constant dense<0.000000e+00> : vector<32x128xf32>
    %6 = tpu.matmul %2, %5, %cst_6 {dimension_numbers = #tpu.dot_dimension_numbers<[1], [0], [0], [1], [0, 0, 1, 1], [], []>} : vector<32x8xf32>, vector<8x128xf32>, vector<32x128xf32> -> vector<32x128xf32>
    %c16 = arith.constant 16 : index
    %c0_7 = arith.constant 0 : index
    %7 = vector.load %arg1[%c16, %c0_7] : memref<848x128xf32, #tpu.memory_space<vmem>>, vector<8x128xf32>
    %cst_8 = arith.constant dense<0.000000e+00> : vector<32x128xf32>
    %8 = tpu.matmul %2, %7, %cst_8 {dimension_numbers = #tpu.dot_dimension_numbers<[1], [0], [0], [1], [0, 0, 1, 1], [], []>} : vector<32x8xf32>, vector<8x128xf32>, vector<32x128xf32> -> vector<32x128xf32>
    %cst_9 = arith.constant dense<0.000000e+00> : vector<32x128xf32>
    %9 = tpu.matmul %0, %4, %cst_9 {dimension_numbers = #tpu.dot_dimension_numbers<[1], [0], [0], [1], [0, 0, 1, 1], [], []>} : vector<32x32xf32>, vector<32x128xf32>, vector<32x128xf32> -> vector<32x128xf32>
    %10 = arith.addf %9, %6 : vector<32x128xf32>
    %cst_10 = arith.constant dense<0.000000e+00> : vector<32x128xf32>
    %11 = tpu.matmul %1, %8, %cst_10 {dimension_numbers = #tpu.dot_dimension_numbers<[1], [0], [0], [1], [0, 0, 1, 1], [], []>} : vector<32x32xf32>, vector<32x128xf32>, vector<32x128xf32> -> vector<32x128xf32>
    %12 = arith.addf %10, %11 : vector<32x128xf32>
    %c24 = arith.constant 24 : index
    %c0_11 = arith.constant 0 : index
    %13 = vector.load %arg1[%c24, %c0_11] : memref<848x128xf32, #tpu.memory_space<vmem>>, vector<1x128xf32>
    %14 = vector.broadcast %13 : vector<1x128xf32> to vector<32x128xf32>
    %15 = arith.addf %12, %14 : vector<32x128xf32>
    %cst_12 = arith.constant 0.000000e+00 : f32
    %16 = vector.broadcast %cst_12 : f32 to vector<32x128xf32>
    %17 = arith.maximumf %15, %16 : vector<32x128xf32>
    %18 = vector.extract_strided_slice %17 {offsets = [0, 0], sizes = [32, 64], strides = [1, 1]} : vector<32x128xf32> to vector<32x64xf32>
    %c32 = arith.constant 32 : index
    %c0_13 = arith.constant 0 : index
    %19 = vector.load %arg1[%c32, %c0_13] : memref<848x128xf32, #tpu.memory_space<vmem>>, vector<64x128xf32>
    %cst_14 = arith.constant dense<0.000000e+00> : vector<32x128xf32>
    %20 = tpu.matmul %18, %19, %cst_14 {dimension_numbers = #tpu.dot_dimension_numbers<[1], [0], [0], [1], [0, 0, 1, 1], [], []>} : vector<32x64xf32>, vector<64x128xf32>, vector<32x128xf32> -> vector<32x128xf32>
    %c96 = arith.constant 96 : index
    %c0_15 = arith.constant 0 : index
    %21 = vector.load %arg1[%c96, %c0_15] : memref<848x128xf32, #tpu.memory_space<vmem>>, vector<64x128xf32>
    %cst_16 = arith.constant dense<0.000000e+00> : vector<32x128xf32>
    %22 = tpu.matmul %18, %21, %cst_16 {dimension_numbers = #tpu.dot_dimension_numbers<[1], [0], [0], [1], [0, 0, 1, 1], [], []>} : vector<32x64xf32>, vector<64x128xf32>, vector<32x128xf32> -> vector<32x128xf32>
    %c160 = arith.constant 160 : index
    %c0_17 = arith.constant 0 : index
    %23 = vector.load %arg1[%c160, %c0_17] : memref<848x128xf32, #tpu.memory_space<vmem>>, vector<64x128xf32>
    %cst_18 = arith.constant dense<0.000000e+00> : vector<32x128xf32>
    %24 = tpu.matmul %18, %23, %cst_18 {dimension_numbers = #tpu.dot_dimension_numbers<[1], [0], [0], [1], [0, 0, 1, 1], [], []>} : vector<32x64xf32>, vector<64x128xf32>, vector<32x128xf32> -> vector<32x128xf32>
    %cst_19 = arith.constant dense<0.000000e+00> : vector<32x128xf32>
    %25 = tpu.matmul %0, %20, %cst_19 {dimension_numbers = #tpu.dot_dimension_numbers<[1], [0], [0], [1], [0, 0, 1, 1], [], []>} : vector<32x32xf32>, vector<32x128xf32>, vector<32x128xf32> -> vector<32x128xf32>
    %26 = arith.addf %25, %22 : vector<32x128xf32>
    %cst_20 = arith.constant dense<0.000000e+00> : vector<32x128xf32>
    %27 = tpu.matmul %1, %24, %cst_20 {dimension_numbers = #tpu.dot_dimension_numbers<[1], [0], [0], [1], [0, 0, 1, 1], [], []>} : vector<32x32xf32>, vector<32x128xf32>, vector<32x128xf32> -> vector<32x128xf32>
    %28 = arith.addf %26, %27 : vector<32x128xf32>
    %c224 = arith.constant 224 : index
    %c0_21 = arith.constant 0 : index
    %29 = vector.load %arg1[%c224, %c0_21] : memref<848x128xf32, #tpu.memory_space<vmem>>, vector<1x128xf32>
    %30 = vector.broadcast %29 : vector<1x128xf32> to vector<32x128xf32>
    %31 = arith.addf %28, %30 : vector<32x128xf32>
    %cst_22 = arith.constant 0.000000e+00 : f32
    %32 = vector.broadcast %cst_22 : f32 to vector<32x128xf32>
    %33 = arith.maximumf %31, %32 : vector<32x128xf32>
    %c296 = arith.constant 296 : index
    %c0_23 = arith.constant 0 : index
    %34 = vector.load %arg1[%c296, %c0_23] : memref<848x128xf32, #tpu.memory_space<vmem>>, vector<8x32xf32>
    %cst_24 = arith.constant dense<0.000000e+00> : vector<8x128xf32>
    %35 = tpu.matmul %34, %33, %cst_24 {dimension_numbers = #tpu.dot_dimension_numbers<[1], [0], [0], [1], [0, 0, 1, 1], [], []>} : vector<8x32xf32>, vector<32x128xf32>, vector<8x128xf32> -> vector<8x128xf32>
    %c304 = arith.constant 304 : index
    %c0_25 = arith.constant 0 : index
    %36 = vector.load %arg1[%c304, %c0_25] : memref<848x128xf32, #tpu.memory_space<vmem>>, vector<128x128xf32>
    %cst_26 = arith.constant dense<0.000000e+00> : vector<8x128xf32>
    %37 = tpu.matmul %35, %36, %cst_26 {dimension_numbers = #tpu.dot_dimension_numbers<[1], [0], [0], [1], [0, 0, 1, 1], [], []>} : vector<8x128xf32>, vector<128x128xf32>, vector<8x128xf32> -> vector<8x128xf32>
    %c432 = arith.constant 432 : index
    %c0_27 = arith.constant 0 : index
    %38 = vector.load %arg1[%c432, %c0_27] : memref<848x128xf32, #tpu.memory_space<vmem>>, vector<1x128xf32>
    %39 = vector.broadcast %38 : vector<1x128xf32> to vector<8x128xf32>
    %40 = arith.addf %37, %39 : vector<8x128xf32>
    %cst_28 = arith.constant 0.000000e+00 : f32
    %41 = vector.broadcast %cst_28 : f32 to vector<8x128xf32>
    %42 = arith.maximumf %40, %41 : vector<8x128xf32>
    %43 = vector.extract_strided_slice %42 {offsets = [0, 0], sizes = [8, 32], strides = [1, 1]} : vector<8x128xf32> to vector<8x32xf32>
    %c440 = arith.constant 440 : index
    %c0_29 = arith.constant 0 : index
    %44 = vector.load %arg1[%c440, %c0_29] : memref<848x128xf32, #tpu.memory_space<vmem>>, vector<32x128xf32>
    %cst_30 = arith.constant dense<0.000000e+00> : vector<8x128xf32>
    %45 = tpu.matmul %43, %44, %cst_30 {dimension_numbers = #tpu.dot_dimension_numbers<[1], [0], [0], [1], [0, 0, 1, 1], [], []>} : vector<8x32xf32>, vector<32x128xf32>, vector<8x128xf32> -> vector<8x128xf32>
    %c472 = arith.constant 472 : index
    %c0_31 = arith.constant 0 : index
    %46 = vector.load %arg1[%c472, %c0_31] : memref<848x128xf32, #tpu.memory_space<vmem>>, vector<1x128xf32>
    %47 = vector.broadcast %46 : vector<1x128xf32> to vector<8x128xf32>
    %48 = arith.addf %45, %47 : vector<8x128xf32>
    %c480 = arith.constant 480 : index
    %c0_32 = arith.constant 0 : index
    %49 = vector.load %arg1[%c480, %c0_32] : memref<848x128xf32, #tpu.memory_space<vmem>>, vector<32x128xf32>
    %cst_33 = arith.constant dense<0.000000e+00> : vector<8x128xf32>
    %50 = tpu.matmul %43, %49, %cst_33 {dimension_numbers = #tpu.dot_dimension_numbers<[1], [0], [0], [1], [0, 0, 1, 1], [], []>} : vector<8x32xf32>, vector<32x128xf32>, vector<8x128xf32> -> vector<8x128xf32>
    %c512 = arith.constant 512 : index
    %c0_34 = arith.constant 0 : index
    %51 = vector.load %arg1[%c512, %c0_34] : memref<848x128xf32, #tpu.memory_space<vmem>>, vector<1x128xf32>
    %52 = vector.broadcast %51 : vector<1x128xf32> to vector<8x128xf32>
    %53 = arith.addf %50, %52 : vector<8x128xf32>
    %c520 = arith.constant 520 : index
    %c0_35 = arith.constant 0 : index
    %54 = vector.load %arg1[%c520, %c0_35] : memref<848x128xf32, #tpu.memory_space<vmem>>, vector<32x128xf32>
    %cst_36 = arith.constant dense<0.000000e+00> : vector<8x128xf32>
    %55 = tpu.matmul %43, %54, %cst_36 {dimension_numbers = #tpu.dot_dimension_numbers<[1], [0], [0], [1], [0, 0, 1, 1], [], []>} : vector<8x32xf32>, vector<32x128xf32>, vector<8x128xf32> -> vector<8x128xf32>
    %c552 = arith.constant 552 : index
    %c0_37 = arith.constant 0 : index
    %56 = vector.load %arg1[%c552, %c0_37] : memref<848x128xf32, #tpu.memory_space<vmem>>, vector<1x128xf32>
    %57 = vector.broadcast %56 : vector<1x128xf32> to vector<8x128xf32>
    %58 = arith.addf %55, %57 : vector<8x128xf32>
    %59 = arith.negf %58 : vector<8x128xf32>
    %60 = math.exp %59 : vector<8x128xf32>
    %cst_38 = arith.constant 1.000000e+00 : f32
    %61 = vector.broadcast %cst_38 : f32 to vector<8x128xf32>
    %62 = arith.addf %61, %60 : vector<8x128xf32>
    %63 = arith.divf %61, %62 : vector<8x128xf32>
    %64 = arith.negf %48 : vector<8x128xf32>
    %65 = math.exp %64 : vector<8x128xf32>
    %cst_39 = arith.constant 1.000000e+00 : f32
    %66 = vector.broadcast %cst_39 : f32 to vector<8x128xf32>
    %67 = arith.addf %66, %65 : vector<8x128xf32>
    %68 = arith.divf %66, %67 : vector<8x128xf32>
    %69 = math.tanh %53 : vector<8x128xf32>
    %70 = arith.mulf %68, %69 : vector<8x128xf32>
    %71 = math.tanh %70 : vector<8x128xf32>
    %72 = arith.mulf %63, %71 : vector<8x128xf32>
    %73 = vector.extract_strided_slice %72 {offsets = [0, 0], sizes = [8, 64], strides = [1, 1]} : vector<8x128xf32> to vector<8x64xf32>
    %c560 = arith.constant 560 : index
    %c0_40 = arith.constant 0 : index
    %74 = vector.load %arg1[%c560, %c0_40] : memref<848x128xf32, #tpu.memory_space<vmem>>, vector<64x128xf32>
    %cst_41 = arith.constant dense<0.000000e+00> : vector<8x128xf32>
    %75 = tpu.matmul %73, %74, %cst_41 {dimension_numbers = #tpu.dot_dimension_numbers<[1], [0], [0], [1], [0, 0, 1, 1], [], []>} : vector<8x64xf32>, vector<64x128xf32>, vector<8x128xf32> -> vector<8x128xf32>
    %c624 = arith.constant 624 : index
    %c0_42 = arith.constant 0 : index
    %76 = vector.load %arg1[%c624, %c0_42] : memref<848x128xf32, #tpu.memory_space<vmem>>, vector<1x128xf32>
    %77 = vector.broadcast %76 : vector<1x128xf32> to vector<8x128xf32>
    %78 = arith.addf %75, %77 : vector<8x128xf32>
    %c632 = arith.constant 632 : index
    %c0_43 = arith.constant 0 : index
    %79 = vector.load %arg1[%c632, %c0_43] : memref<848x128xf32, #tpu.memory_space<vmem>>, vector<64x128xf32>
    %cst_44 = arith.constant dense<0.000000e+00> : vector<8x128xf32>
    %80 = tpu.matmul %73, %79, %cst_44 {dimension_numbers = #tpu.dot_dimension_numbers<[1], [0], [0], [1], [0, 0, 1, 1], [], []>} : vector<8x64xf32>, vector<64x128xf32>, vector<8x128xf32> -> vector<8x128xf32>
    %c696 = arith.constant 696 : index
    %c0_45 = arith.constant 0 : index
    %81 = vector.load %arg1[%c696, %c0_45] : memref<848x128xf32, #tpu.memory_space<vmem>>, vector<1x128xf32>
    %82 = vector.broadcast %81 : vector<1x128xf32> to vector<8x128xf32>
    %83 = arith.addf %80, %82 : vector<8x128xf32>
    %c704 = arith.constant 704 : index
    %c0_46 = arith.constant 0 : index
    %84 = vector.load %arg1[%c704, %c0_46] : memref<848x128xf32, #tpu.memory_space<vmem>>, vector<64x128xf32>
    %cst_47 = arith.constant dense<0.000000e+00> : vector<8x128xf32>
    %85 = tpu.matmul %73, %84, %cst_47 {dimension_numbers = #tpu.dot_dimension_numbers<[1], [0], [0], [1], [0, 0, 1, 1], [], []>} : vector<8x64xf32>, vector<64x128xf32>, vector<8x128xf32> -> vector<8x128xf32>
    %c768 = arith.constant 768 : index
    %c0_48 = arith.constant 0 : index
    %86 = vector.load %arg1[%c768, %c0_48] : memref<848x128xf32, #tpu.memory_space<vmem>>, vector<1x128xf32>
    %87 = vector.broadcast %86 : vector<1x128xf32> to vector<8x128xf32>
    %88 = arith.addf %85, %87 : vector<8x128xf32>
    %89 = arith.negf %88 : vector<8x128xf32>
    %90 = math.exp %89 : vector<8x128xf32>
    %cst_49 = arith.constant 1.000000e+00 : f32
    %91 = vector.broadcast %cst_49 : f32 to vector<8x128xf32>
    %92 = arith.addf %91, %90 : vector<8x128xf32>
    %93 = arith.divf %91, %92 : vector<8x128xf32>
    %94 = arith.negf %78 : vector<8x128xf32>
    %95 = math.exp %94 : vector<8x128xf32>
    %cst_50 = arith.constant 1.000000e+00 : f32
    %96 = vector.broadcast %cst_50 : f32 to vector<8x128xf32>
    %97 = arith.addf %96, %95 : vector<8x128xf32>
    %98 = arith.divf %96, %97 : vector<8x128xf32>
    %99 = math.tanh %83 : vector<8x128xf32>
    %100 = arith.mulf %98, %99 : vector<8x128xf32>
    %101 = math.tanh %100 : vector<8x128xf32>
    %102 = arith.mulf %93, %101 : vector<8x128xf32>
    %103 = vector.extract_strided_slice %102 {offsets = [0, 0], sizes = [8, 64], strides = [1, 1]} : vector<8x128xf32> to vector<8x64xf32>
    %c776 = arith.constant 776 : index
    %c0_51 = arith.constant 0 : index
    %104 = vector.load %arg1[%c776, %c0_51] : memref<848x128xf32, #tpu.memory_space<vmem>>, vector<64x128xf32>
    %cst_52 = arith.constant dense<0.000000e+00> : vector<8x128xf32>
    %105 = tpu.matmul %103, %104, %cst_52 {dimension_numbers = #tpu.dot_dimension_numbers<[1], [0], [0], [1], [0, 0, 1, 1], [], []>} : vector<8x64xf32>, vector<64x128xf32>, vector<8x128xf32> -> vector<8x128xf32>
    %c840 = arith.constant 840 : index
    %c0_53 = arith.constant 0 : index
    %106 = vector.load %arg1[%c840, %c0_53] : memref<848x128xf32, #tpu.memory_space<vmem>>, vector<1x128xf32>
    %107 = vector.broadcast %106 : vector<1x128xf32> to vector<8x128xf32>
    %108 = arith.addf %105, %107 : vector<8x128xf32>
    %c0_54 = arith.constant 0 : index
    %c0_55 = arith.constant 0 : index
    %109 = vector.load %arg2[%c0_54, %c0_55] : memref<8x128xf32, #tpu.memory_space<vmem>>, vector<8x128xf32>
    tpu.vector_store %arg2[%c0_54, %c0_55], %108 {strides = array<i32>} : memref<8x128xf32, #tpu.memory_space<vmem>>, vector<8x128xf32>,
    return
  }
}

</mosaic_0001>

<bundles_post_ra>
// kernel: forward.1
= control target key start
LH: loop header
LB: loop body
LE: loop exit
PB: predicated region body
PF: predicated region fallthrough
CT: control target
= control target key end

     0   :  { %7 = vsyncpa [#allocation3], 0  ;;  %s2548_s9 = smov [#allocation2]   ;;  %s2726_s0 = inlined_call_operand.vmem [shape: f32[32,8], index: 0, kind: input, shape index: {}]   ;;  %s2727_s1 = inlined_call_operand.hbm [shape: f32[848,128], index: 1, kind: input, shape index: {}]   ;;  %s2728_s2 = inlined_call_operand.vmem [shape: f32[8,128], index: 2, kind: output, shape index: {}]  }
   0x1   :  { %s15_s10 = sshll.u32 %s2548_s9, 4  ;;  %s2524_s13 = scalar_lea.hbm %s2727_s1, 13568  ;;  %s16_s10 = int_to_ptr.vmem [resolvable:$true] %s15_s10 }
   0x2   :  { %p2525_p0 = scmp.ne.s32.totalorder %s2727_s1, %s2524_s13  ;;  %p2528_p1 = scmp.lt.u32.totalorder %s2524_s13, %s2727_s1 }
   0x4   :  { %p2530_p2 = pnand %p2528_p1, %p2525_p0 }
   0x6   :  { %2533 = shalt.err (!%p2530_p2)
}
   0x7   :  { %s2534_s18 = scalar_lea.vmem %s16_s10, 13568  ;;  %p2539_p4 = scmp.lt.s32.totalorder %s16_s10, %s16_s10 }
   0x8   :  { %p2535_p3 = scmp.ne.s32.totalorder %s16_s10, %s2534_s18  ;;  %p2540_p5 = scmp.lt.s32.totalorder %s2534_s18, %s2534_s18 }
   0xa   :  { %p2541_p6 = por %p2540_p5, %p2539_p4 }
   0xc   :  { %p2542_p7 = pnand %p2541_p6, %p2535_p3 }
   0xe   :  { %2545 = shalt.err (!%p2542_p7)
}
   0xf   :  { %s2549_s19 = smov 128   ;;  %s2550_s20 = smov 8  }
  0x10   :  { %21 = dma.hbm_to_vmem [thread:$0]  %s2727_s1, 13568, %s16_s10, [#allocation3], %s2549_s19, %s2549_s19, %s2550_s20  }
  0x11   :  { %2546 = dma.done.wait [#allocation3], 13568  }
  0x12   :  { %2547 = vsyncadd [#allocation3], 4294953728  ;;  %vm38_vm0 = vcmask 64512   ;;  %v37_v0 = vld [vmem:[#allocation2] sm:$0xff]  ;;  %v34_v2 = vld [vmem:[%s2726_s0 + $0x8] sm:$0xff]  ;;  %vm308_vm1 = vcmask 261120  }
  0x13   :  { %v33_v1 = vld [vmem:[%s2726_s0] sm:$0xff]  ;;  %1999 = vmatprep.subr.mxu0 %v37_v0  ;;  %v35_v3 = vld [vmem:[%s2726_s0 + $0x10] sm:$0xff]  ;;  %2476 = vmatprep.subr.mxu1 %v37_v0  ;;  %v36_v5 = vld [vmem:[%s2726_s0 + $0x18] sm:$0xff]  ;;  %vm528_vm2 = vcmask 523264   ;;  %vm2552_vm3 = vmmov 0  }
  0x14   :  { %2001 = vmatprep.mubr.msk.f32.mxu0 %vm38_vm0, %v33_v1  ;;  %v222_v4 = vld [vmem:[#allocation2 + $0x10] sm:$0xff]  ;;  %2000 = vmatpush3.msra.mxu0 %v37_v0  ;;  %v136_v6 = vld [vmem:[#allocation2 + $0x8] sm:$0xff]  ;;  %v520_v8 = vld [vmem:[#allocation2 + $0x20] sm:$0xff] }
  0x15   :  { %2002 = vmatmul.mubr.msk.f32.vlgmr.msra.gmra.mrb[0].mxu0 %vm38_vm0, %v34_v2  ;;  %2477 = vmatpush3.msra.mxu1 %v37_v0  ;;  %v2605_v7 = vld [vmem:[#allocation2 + $0xe8] sm:$0xff]  ;;  %v522_v11 = vld [vmem:[#allocation2 + $0x30] sm:$0xff]  ;;  %v523_v12 = vld [vmem:[#allocation2 + $0x38] sm:$0xff] }
  0x16   :  { %2004 = vmatprep.mubr.msk.f32.mxu1 %vm38_vm0, %v35_v3  ;;  %2015 = vmatprep.subr.mxu0 %v222_v4  ;;  %v521_v9 = vld [vmem:[#allocation2 + $0x28] sm:$0xff]  ;;  %v2320_v13 = vpack.c.bf16 %v523_v12, %v522_v11  ;;  %v524_v14 = vld [vmem:[#allocation2 + $0x40] sm:$0xff]  ;;  %v2609_v28 = vld [vmem:[#allocation2 + $0xf0] sm:$0xff] }
  0x17   :  { %2005 = vmatmul.mubr.msk.f32.vlgmr.msra.gmra.mrb[0].mxu1 %vm38_vm0, %v36_v5  ;;  %2016 = vmatpush3.msra.mxu0 %v222_v4  ;;  %v2316_v10 = vpack.c.bf16 %v521_v9, %v520_v8  ;;  %v525_v15 = vld [vmem:[#allocation2 + $0x48] sm:$0xff]  ;;  %v2611_v30 = vld [vmem:[#allocation2 + $0xf8] sm:$0xff]  ;;  %v626_v31 = vld [vmem:[#allocation2 + $0x60] sm:$0xff] }
  0x18   :  { %2017 = vmatprep.mubr.msk.f32.mxu0 %vm38_vm0, %v33_v1  ;;  %2009 = vmatprep.mubr.msk.f32.mxu1 %vm38_vm0, %v33_v1  ;;  %v2324_v16 = vpack.c.bf16 %v525_v15, %v524_v14  ;;  %v627_v32 = vld [vmem:[#allocation2 + $0x68] sm:$0xff]  ;;  %v2617_v33 = vld [vmem:[#allocation2 + $0x100] sm:$0xff]  ;;  %v628_v36 = vld [vmem:[#allocation2 + $0x70] sm:$0xff] }
  0x19   :  { %2018 = vmatmul.mubr.msk.f32.vlgmr.msra.gmra.mrb[2].mxu0 %vm38_vm0, %v34_v2  ;;  %2007 = vmatprep.subr.mxu1 %v136_v6  ;;  %v2619_v34 = vld [vmem:[#allocation2 + $0x108] sm:$0xff]  ;;  %v2332_v35 = vpack.c.bf16 %v627_v32, %v626_v31  ;;  %v629_v37 = vld [vmem:[#allocation2 + $0x78] sm:$0xff]  ;;  %v2625_v38 = vld [vmem:[#allocation2 + $0x110] sm:$0xff] }
  0x1a   :  { %2020 = vmatprep.mubr.msk.f32.mxu0 %vm38_vm0, %v35_v3  ;;  %2008 = vmatpush3.msra.mxu1 %v136_v6  ;;  %v2627_v39 = vld [vmem:[#allocation2 + $0x118] sm:$0xff]  ;;  %v2336_v40 = vpack.c.bf16 %v629_v37, %v628_v36  ;;  %v630_v41 = vld [vmem:[#allocation2 + $0x80] sm:$0xff]  ;;  %v631_v42 = vld [vmem:[#allocation2 + $0x88] sm:$0xff] }
  0x1b   :  { %2010 = vmatmul.mubr.msk.f32.vlgmr.msra.gmra.mrb[2].mxu1 %vm38_vm0, %v34_v2  ;;  %2317 = vmatprep.subr.bf16.mxu0 %v2316_v10  ;;  %v2633_v43 = vld [vmem:[#allocation2 + $0x120] sm:$0xff]  ;;  %v2340_v44 = vpack.c.bf16 %v631_v42, %v630_v41  ;;  %v526_v45 = vld [vmem:[#allocation2 + $0x50] sm:$0xff]  ;;  %v527_v46 = vld [vmem:[#allocation2 + $0x58] sm:$0xff] }
  0x1c   :  { %2012 = vmatprep.mubr.msk.f32.mxu1 %vm38_vm0, %v35_v3  ;;  %2319 = vmatpush3.bf16.msra.mxu0 %v2316_v10  ;;  %v2328_v47 = vpack.c.bf16 %v527_v46, %v526_v45  ;;  %v632_v48 = vld [vmem:[#allocation2 + $0x90] sm:$0xff]  ;;  %v633_v49 = vld [vmem:[#allocation2 + $0x98] sm:$0xff]  ;;  %v719_v51 = vld [vmem:[#allocation2 + $0xa0] sm:$0xff] }
  0x1d   :  { %2021 = vmatmul.mubr.msk.f32.gmra.mrb[4].mxu0 %vm38_vm0, %v36_v5  ;;  %2321 = vmatprep.subr.bf16.mxu0 %v2320_v13  ;;  %v2344_v50 = vpack.c.bf16 %v633_v49, %v632_v48  ;;  %v720_v52 = vld [vmem:[#allocation2 + $0xa8] sm:$0xff]  ;;  %v1801_v54 = vld [vmem:[#allocation2 + $0x18] ss:$0 sm:$0xff]  ;;  %v721_v59 = vld [vmem:[#allocation2 + $0xb0] sm:$0xff] }
  0x1e   :  { %v2348_v53 = vpack.c.bf16 %v720_v52, %v719_v51  ;;  %v722_v60 = vld [vmem:[#allocation2 + $0xb8] sm:$0xff]  ;;  %v723_v4 = vld [vmem:[#allocation2 + $0xc0] sm:$0xff]  ;;  %v725_v10 = vld [vmem:[#allocation2 + $0xd0] sm:$0xff] }
  0x1f   :  { %2013 = vmatmul.mubr.msk.f32.gmra.mrb[4].mxu1 %vm38_vm0, %v36_v5  ;;  %v2352_v2 = vpack.c.bf16 %v722_v60, %v721_v59  ;;  %v724_v5 = vld [vmem:[#allocation2 + $0xc8] sm:$0xff]  ;;  %v726_v11 = vld [vmem:[#allocation2 + $0xd8] sm:$0xff]  ;;  %v1075_v45 = vld [vmem:[#allocation2 + $0x140] sm:$0xff] }
  0x20   :  { %2031 = vmatprep.mubr.msk.f32.mxu1 %vm308_vm1, %v2605_v7  ;;  %2323 = vmatpush3.bf16.msra.mxu0 %v2320_v13  ;;  %v2356_v9 = vpack.c.bf16 %v724_v5, %v723_v4  ;;  %v2360_v12 = vpack.c.bf16 %v726_v11, %v725_v10  ;;  %v1074_v41 = vld [vmem:[#allocation2 + $0x138] sm:$0xff]  ;;  %v1076_v46 = vld [vmem:[#allocation2 + $0x148] sm:$0xff]  ;;  %v1077_v48 = vld [vmem:[#allocation2 + $0x150] sm:$0xff] }
  0x21   :  { %2325 = vmatprep.subr.bf16.mxu0 %v2324_v16  ;;  %v1078_v49 = vld [vmem:[#allocation2 + $0x158] sm:$0xff]  ;;  %v1079_v51 = vld [vmem:[#allocation2 + $0x160] sm:$0xff]  ;;  %v1080_v52 = vld [vmem:[#allocation2 + $0x168] sm:$0xff] }
  0x22   :  { %v1085_v60 = vld [vmem:[#allocation2 + $0x190] sm:$0xff] }
  0x23   :  { %v1824_v11 = vld [vmem:[#allocation2 + $0x1b0] ss:$0 sm:$0xff] }
  0x24   :  { %2327 = vmatpush3.bf16.msra.mxu0 %v2324_v16 }
  0x25   :  { %2329 = vmatprep.subr.bf16.mxu0 %v2328_v47 }
  0x28   :  { %2331 = vmatpush3.bf16.msra.mxu0 %v2328_v47  ;;  %v2390_v47 = vpack.c.bf16 %v1076_v46, %v1075_v45  ;;  %v1512_v45 = vld [vmem:[#allocation2 + $0x2a0] sm:$0xff] }
  0x29   :  { %2349 = vmatprep.subr.bf16.mxu0 %v2348_v53 }
  0xe8   :  { %v2003_v17 = vpop.f32.mrb[0].mxu0 }
  0xe9   :  { %v117_v18 = vpop.f32.mrb[1].mxu0 }
  0xea   :  { %v2300_v19 = vpack.c.bf16 %v2003_v17, %v117_v18  ;;  %v2006_v20 = vpop.f32.mrb[0].mxu1 }
  0xeb   :  { %v127_v21 = vpop.f32.mrb[1].mxu1 }
  0xec   :  { %v2304_v22 = vpack.c.bf16 %v2006_v20, %v127_v21  ;;  %2301 = vmatprep.subr.bf16.mxu1 %v2300_v19  ;;  %v2019_v23 = vpop.f32.mrb[2].mxu0 }
  0xed   :  { %2303 = vmatpush3.bf16.msra.mxu1 %v2300_v19  ;;  %v289_v24 = vpop.f32.mrb[3].mxu0 }
  0xee   :  { %2305 = vmatprep.subr.bf16.mxu1 %v2304_v22  ;;  %v2308_v25 = vpack.c.bf16 %v2019_v23, %v289_v24  ;;  %v2551_v24 = vmov 0.0|0.0  }
  0xf0   :  { %v2022_v26 = vpop.f32.mrb[4].mxu0 }
  0xf1   :  { %2307 = vmatpush3.bf16.msra.mxu1 %v2304_v22  ;;  %v299_v27 = vpop.f32.mrb[5].mxu0 }
  0xf2   :  { %2309 = vmatprep.subr.bf16.mxu1 %v2308_v25  ;;  %v2312_v29 = vpack.c.bf16 %v2022_v26, %v299_v27  ;;  %v1822_v26 = vld [vmem:[#allocation2 + $0xe0] ss:$0 sm:$0xff] }
  0xf4   :  { %2032 = vmatmul.mubr.msk.f32.vlgmr.msra.gmra.mrb[2].mxu1 %vm308_vm1, %v2609_v28 }
  0xf5   :  { %2311 = vmatpush3.bf16.msra.mxu1 %v2308_v25  ;;  %2034 = vmatprep.mubr.msk.f32.mxu1 %vm308_vm1, %v2611_v30  ;;  %v2553_v25 = vmov 0.0  }
  0xf6   :  { %2313 = vmatprep.subr.bf16.mxu1 %v2312_v29 }
  0xf8   :  { %2035 = vmatmul.mubr.msk.f32.gmra.mrb[4].mxu1 %vm308_vm1, %v2617_v33 }
  0xf9   :  { %2315 = vmatpush3.bf16.msra.mxu1 %v2312_v29  ;;  %2045 = vmatprep.mubr.msk.f32.mxu1 %vm308_vm1, %v2619_v34 }
  0xfa   :  { %2333 = vmatprep.subr.bf16.mxu1 %v2332_v35 }
  0xfc   :  { %2046 = vmatmul.mubr.msk.f32.vlgmr.msra.gmra.mrb[2].mxu1 %vm308_vm1, %v2625_v38 }
  0xfd   :  { %2048 = vmatprep.mubr.msk.f32.mxu1 %vm308_vm1, %v2627_v39  ;;  %2335 = vmatpush3.bf16.msra.mxu1 %v2332_v35 }
  0xfe   :  { %2337 = vmatprep.subr.bf16.mxu1 %v2336_v40 }
 0x100   :  { %2049 = vmatmul.mubr.msk.f32.gmra.mrb[4].mxu1 %vm308_vm1, %v2633_v43 }
 0x101   :  { %2339 = vmatpush3.bf16.msra.mxu1 %v2336_v40  ;;  %v1073_v40 = vld [vmem:[#allocation2 + $0x130] sm:$0xff] }
 0x102   :  { %2341 = vmatprep.subr.bf16.mxu1 %v2340_v44 }
 0x105   :  { %2343 = vmatpush3.bf16.msra.mxu1 %v2340_v44  ;;  %v2387_v44 = vpack.c.bf16 %v1074_v41, %v1073_v40  ;;  %v1425_v41 = vld [vmem:[#allocation2 + $0x250] sm:$0xff] }
 0x106   :  { %2345 = vmatprep.subr.bf16.mxu1 %v2344_v50 }
 0x109   :  { %2347 = vmatpush3.bf16.msra.mxu1 %v2344_v50  ;;  %v2393_v50 = vpack.c.bf16 %v1078_v49, %v1077_v48  ;;  %v1428_v48 = vld [vmem:[#allocation2 + $0x268] sm:$0xff] }
 0x10a   :  { %v1513_v49 = vld [vmem:[#allocation2 + $0x2a8] sm:$0xff] }
 0x1cf   :  { %v2047_v55 = vpop.f32.mrb[2].mxu1 }
 0x1d0   :  { %v513_v56 = vadd.f32 %v2047_v55, %v1801_v54  ;;  %v484_v57 = vpop.f32.mrb[3].mxu1  ;;  %v1082_v55 = vld [vmem:[#allocation2 + $0x178] sm:$0xff] }
 0x1d1   :  { %v512_v58 = vadd.f32 %v1801_v54, %v484_v57  ;;  %v1083_v57 = vld [vmem:[#allocation2 + $0x180] sm:$0xff] }
 0x1d2   :  { %v517_v63 = vmax.f32 %v513_v56, 0.0 }
 0x1d3   :  { %v516_v61 = vmax.f32 %v512_v58, 0.0  ;;  %v2050_v62 = vpop.f32.mrb[4].mxu1  ;;  %v1084_v58 = vld [vmem:[#allocation2 + $0x188] sm:$0xff] }
 0x1d4   :  { %v515_v0 = vadd.f32 %v2050_v62, %v1801_v54  ;;  %v494_v1 = vpop.f32.mrb[5].mxu1  ;;  %v2402_v59 = vpack.c.bf16 %v1084_v58, %v1083_v57 }
 0x1d5   :  { %v514_v3 = vadd.f32 %v1801_v54, %v494_v1  ;;  %2067 = vmatprep.mubr.msk.f32.mxu0 %vm528_vm2, %v516_v61  ;;  %2089 = vmatprep.mubr.msk.f32.mxu1 %vm528_vm2, %v516_v61  ;;  %v1081_v54 = vld [vmem:[#allocation2 + $0x170] sm:$0xff] }
 0x1d6   :  { %2068 = vmatmul.mubr.msk.f32.vlgmr.msra.gmra.mrb[6].mxu0 %vm528_vm2, %v517_v63  ;;  %2090 = vmatmul.mubr.msk.f32.vlgmr.msra.gmra.mrb[6].mxu1 %vm528_vm2, %v517_v63  ;;  %v519_v8 = vmax.f32 %v515_v0, 0.0  ;;  %v2399_v56 = vpack.c.bf16 %v1082_v55, %v1081_v54  ;;  %v1088_v0 = vld [vmem:[#allocation2 + $0x1a8] sm:$0xff] }
 0x1d7   :  { %v518_v6 = vmax.f32 %v514_v3, 0.0  ;;  %2351 = vmatpush3.bf16.msra.mxu0 %v2348_v53  ;;  %v2396_v53 = vpack.c.bf16 %v1080_v52, %v1079_v51  ;;  %v1166_v3 = vld [vmem:[#allocation2 + $0x1c0] sm:$0xff] }
 0x1d8   :  { %2353 = vmatprep.subr.bf16.mxu0 %v2352_v2 }
 0x1d9   :  { %2070 = vmatprep.mubr.msk.f32.mxu0 %vm528_vm2, %v518_v6  ;;  %2092 = vmatprep.mubr.msk.f32.mxu1 %vm528_vm2, %v518_v6 }
 0x1da   :  { %2071 = vmatmul.mubr.msk.f32.gmra.mrb[8].mxu0 %vm528_vm2, %v519_v8  ;;  %2093 = vmatmul.mubr.msk.f32.gmra.mrb[8].mxu1 %vm528_vm2, %v519_v8 }
 0x1db   :  { %2355 = vmatpush3.bf16.msra.mxu0 %v2352_v2  ;;  %2111 = vmatprep.mubr.msk.f32.mxu0 %vm528_vm2, %v516_v61  ;;  %v1086_v61 = vld [vmem:[#allocation2 + $0x198] sm:$0xff] }
 0x1dc   :  { %2357 = vmatprep.subr.bf16.mxu0 %v2356_v9  ;;  %2125 = vmatprep.mubr.msk.f32.mxu1 %vm308_vm1, %v2605_v7  ;;  %v2405_v62 = vpack.c.bf16 %v1086_v61, %v1085_v60  ;;  %v1165_v2 = vld [vmem:[#allocation2 + $0x1b8] sm:$0xff]  ;;  %v1827_v60 = vld [vmem:[#allocation2 + $0x200] ss:$0 sm:$0xff] }
 0x1dd   :  { %v2411_v4 = vpack.c.bf16 %v1166_v3, %v1165_v2 }
 0x1df   :  { %2359 = vmatpush3.bf16.msra.mxu0 %v2356_v9  ;;  %v1168_v9 = vld [vmem:[#allocation2 + $0x1d0] sm:$0xff] }
 0x1e0   :  { %2361 = vmatprep.subr.bf16.mxu0 %v2360_v12 }
 0x1e3   :  { %2363 = vmatpush3.bf16.msra.mxu0 %v2360_v12  ;;  %v1247_v12 = vld [vmem:[#allocation2 + $0x1e0] sm:$0xff] }
 0x1e4   :  { %2380 = vmatprep.subr.bf16.mxu0 %v2551_v24 }
 0x1e6   :  { %2112 = vmatmul.mubr.msk.f32.vlgmr.msra.gmra.mrb[10].mxu0 %vm528_vm2, %v517_v63  ;;  %v1087_v63 = vld [vmem:[#allocation2 + $0x1a0] sm:$0xff] }
 0x1e7   :  { %2114 = vmatprep.mubr.msk.f32.mxu0 %vm528_vm2, %v518_v6  ;;  %v2408_v1 = vpack.c.bf16 %v1088_v0, %v1087_v63 }
 0x1ea   :  { %2115 = vmatmul.mubr.msk.f32.gmra.mrb[12].mxu0 %vm528_vm2, %v519_v8  ;;  %v1167_v8 = vld [vmem:[#allocation2 + $0x1c8] sm:$0xff] }
 0x1eb   :  { %2153 = vmatprep.mubr.msk.f32.mxu0 %vm2552_vm3, %v2553_v25  ;;  %v2414_v10 = vpack.c.bf16 %v1168_v9, %v1167_v8 }
 0x2a9   :  { %v2069_v13 = vpop.f32.mrb[6].mxu0 }
 0x2aa   :  { %v607_v14 = vpop.f32.mrb[7].mxu0 }
 0x2ab   :  { %v2364_v15 = vpack.c.bf16 %v2069_v13, %v607_v14  ;;  %v1248_v13 = vld [vmem:[#allocation2 + $0x1e8] sm:$0xff] }
 0x2ad   :  { %v2072_v16 = vpop.f32.mrb[8].mxu0  ;;  %2365 = vmatprep.subr.bf16.mxu1 %v2364_v15 }
 0x2ae   :  { %v617_v17 = vpop.f32.mrb[9].mxu0  ;;  %2367 = vmatpush3.bf16.msra.mxu1 %v2364_v15 }
 0x2af   :  { %v2368_v18 = vpack.c.bf16 %v2072_v16, %v617_v17  ;;  %v2417_v17 = vpack.c.bf16 %v1248_v13, %v1247_v12  ;;  %v1591_v12 = vld [vmem:[#allocation2 + $0x2c8] sm:$0xff] }
 0x2b1   :  { %2369 = vmatprep.subr.bf16.mxu1 %v2368_v18 }
 0x2b2   :  { %2371 = vmatpush3.bf16.msra.mxu1 %v2368_v18 }
 0x2b5   :  { %2126 = vmatmul.mubr.msk.f32.vlgmr.msra.gmra.mrb[6].mxu1 %vm308_vm1, %v2609_v28 }
 0x2b6   :  { %2128 = vmatprep.mubr.msk.f32.mxu1 %vm308_vm1, %v2611_v30 }
 0x2b9   :  { %v2113_v7 = vpop.f32.mrb[10].mxu0  ;;  %2129 = vmatmul.mubr.msk.f32.gmra.mrb[8].mxu1 %vm308_vm1, %v2617_v33 }
 0x2ba   :  { %v793_v19 = vpop.f32.mrb[11].mxu0  ;;  %2139 = vmatprep.mubr.msk.f32.mxu1 %vm308_vm1, %v2619_v34 }
 0x2bb   :  { %v2372_v20 = vpack.c.bf16 %v2113_v7, %v793_v19  ;;  %v1249_v7 = vld [vmem:[#allocation2 + $0x1f0] sm:$0xff]  ;;  %v1250_v19 = vld [vmem:[#allocation2 + $0x1f8] sm:$0xff] }
 0x2bd   :  { %v2116_v21 = vpop.f32.mrb[12].mxu0  ;;  %2373 = vmatprep.subr.bf16.mxu1 %v2372_v20 }
 0x2be   :  { %v803_v22 = vpop.f32.mrb[13].mxu0  ;;  %2375 = vmatpush3.bf16.msra.mxu1 %v2372_v20  ;;  %v2420_v20 = vpack.c.bf16 %v1250_v19, %v1249_v7  ;;  %v1594_v19 = vld [vmem:[#allocation2 + $0x2e0] sm:$0xff] }
 0x2bf   :  { %v2376_v23 = vpack.c.bf16 %v2116_v21, %v803_v22  ;;  %v1326_v21 = vld [vmem:[#allocation2 + $0x208] sm:$0xff]  ;;  %v1327_v22 = vld [vmem:[#allocation2 + $0x210] sm:$0xff] }
 0x2c1   :  { %2377 = vmatprep.subr.bf16.mxu1 %v2376_v23 }
 0x2c2   :  { %2379 = vmatpush3.bf16.msra.mxu1 %v2376_v23  ;;  %v2423_v23 = vpack.c.bf16 %v1327_v22, %v1326_v21  ;;  %v1596_v22 = vld [vmem:[#allocation2 + $0x2f0] sm:$0xff] }
 0x2c3   :  { %2410 = vmatprep.subr.bf16.mxu1 %v2551_v24 }
 0x2c5   :  { %2140 = vmatmul.mubr.msk.f32.vlgmr.msra.gmra.mrb[6].mxu1 %vm308_vm1, %v2625_v38 }
 0x2c6   :  { %2142 = vmatprep.mubr.msk.f32.mxu1 %vm308_vm1, %v2627_v39  ;;  %2412 = vmatpush3.bf16.msra.mxu1 %v2411_v4 }
 0x2c7   :  { %2413 = vmatprep.subr.bf16.mxu1 %v2551_v24 }
 0x2c9   :  { %2143 = vmatmul.mubr.msk.f32.gmra.mrb[8].mxu1 %vm308_vm1, %v2633_v43  ;;  %v999_v43 = vld [vmem:[#allocation2 + $0x128] sm:$0xff] }
 0x2ca   :  { %2199 = vmatprep.mubr.msk.f32.mxu1 %vm2552_vm3, %v2553_v25  ;;  %2415 = vmatpush3.bf16.msra.mxu1 %v2414_v10 }
 0x2cb   :  { %2416 = vmatprep.subr.bf16.mxu1 %v2551_v24 }
 0x398   :  { %v2141_v27 = vpop.f32.mrb[6].mxu1 }
 0x399   :  { %v992_v28 = vadd.f32 %v2141_v27, %v1822_v26  ;;  %v963_v29 = vpop.f32.mrb[7].mxu1  ;;  %v1329_v27 = vld [vmem:[#allocation2 + $0x220] sm:$0xff] }
 0x39a   :  { %v991_v30 = vadd.f32 %v1822_v26, %v963_v29  ;;  %v1421_v29 = vld [vmem:[#allocation2 + $0x230] sm:$0xff] }
 0x39b   :  { %v996_v31 = vmax.f32 %v992_v28, 0.0 }
 0x39c   :  { %v995_v32 = vmax.f32 %v991_v30, 0.0  ;;  %v2144_v33 = vpop.f32.mrb[8].mxu1  ;;  %v1422_v30 = vld [vmem:[#allocation2 + $0x238] sm:$0xff] }
 0x39d   :  { %v994_v34 = vadd.f32 %v2144_v33, %v1822_v26  ;;  %v973_v35 = vpop.f32.mrb[9].mxu1  ;;  %v1508_v33 = vld [vmem:[#allocation2 + $0x280] sm:$0xff] }
 0x39e   :  { %v2381_v36 = vpack.c.bf16 %v996_v31, %v995_v32  ;;  %v993_v37 = vadd.f32 %v1822_v26, %v973_v35  ;;  %v1328_v26 = vld [vmem:[#allocation2 + $0x218] sm:$0xff]  ;;  %v2429_v31 = vpack.c.bf16 %v1422_v30, %v1421_v29  ;;  %v1423_v35 = vld [vmem:[#allocation2 + $0x240] sm:$0xff] }
 0x39f   :  { %v998_v38 = vmax.f32 %v994_v34, 0.0  ;;  %v2426_v28 = vpack.c.bf16 %v1329_v27, %v1328_v26  ;;  %v1507_v32 = vld [vmem:[#allocation2 + $0x278] sm:$0xff]  ;;  %v1689_v27 = vld [vmem:[#allocation2 + $0x308] sm:$0xff]  ;;  %v1692_v30 = vld [vmem:[#allocation2 + $0x320] sm:$0xff] }
 0x3a0   :  { %v997_v39 = vmax.f32 %v993_v37, 0.0  ;;  %2382 = vmatpush3.bf16.msra.mxu0 %v2381_v36  ;;  %v2441_v34 = vpack.c.bf16 %v1508_v33, %v1507_v32  ;;  %v1424_v36 = vld [vmem:[#allocation2 + $0x248] sm:$0xff]  ;;  %v1694_v33 = vld [vmem:[#allocation2 + $0x330] sm:$0xff] }
 0x3a1   :  { %2383 = vmatprep.subr.bf16.mxu0 %v2551_v24  ;;  %v2432_v37 = vpack.c.bf16 %v1424_v36, %v1423_v35  ;;  %v1693_v32 = vld [vmem:[#allocation2 + $0x328] sm:$0xff]  ;;  %v1695_v35 = vld [vmem:[#allocation2 + $0x338] sm:$0xff]  ;;  %v1696_v36 = vld [vmem:[#allocation2 + $0x340] sm:$0xff] }
 0x3a2   :  { %v2384_v42 = vpack.c.bf16 %v998_v38, %v997_v39  ;;  %v1509_v38 = vld [vmem:[#allocation2 + $0x288] sm:$0xff]  ;;  %v1510_v39 = vld [vmem:[#allocation2 + $0x290] sm:$0xff] }
 0x3a3   :  { %v2444_v40 = vpack.c.bf16 %v1510_v39, %v1509_v38  ;;  %v1833_v38 = vld [vmem:[#allocation2 + $0x270] ss:$0 sm:$0xff] }
 0x3a4   :  { %2385 = vmatpush3.bf16.msra.mxu0 %v2384_v42  ;;  %v1426_v42 = vld [vmem:[#allocation2 + $0x258] sm:$0xff] }
 0x3a5   :  { %2386 = vmatprep.subr.bf16.mxu0 %v2551_v24 }
 0x3a7   :  { %2154 = vmatmul.mubr.msk.f32.vlgmr.msra.gmra.mrb[14].mxu0 %vm308_vm1, %v999_v43  ;;  %v1511_v43 = vld [vmem:[#allocation2 + $0x298] sm:$0xff] }
 0x3a8   :  { %2388 = vmatpush3.bf16.msra.mxu0 %v2387_v44  ;;  %2188 = vmatprep.mubr.msk.f32.mxu0 %vm2552_vm3, %v2553_v25  ;;  %v2435_v44 = vpack.c.bf16 %v1426_v42, %v1425_v41  ;;  %v2447_v46 = vpack.c.bf16 %v1512_v45, %v1511_v43  ;;  %v1835_v45 = vld [vmem:[#allocation2 + $0x2b8] ss:$0 sm:$0xff] }
 0x3a9   :  { %2389 = vmatprep.subr.bf16.mxu0 %v2551_v24 }
 0x3ac   :  { %2391 = vmatpush3.bf16.msra.mxu0 %v2390_v47  ;;  %v1427_v47 = vld [vmem:[#allocation2 + $0x260] sm:$0xff] }
 0x3ad   :  { %2392 = vmatprep.subr.bf16.mxu0 %v2551_v24  ;;  %v2438_v51 = vpack.c.bf16 %v1428_v48, %v1427_v47  ;;  %v1837_v47 = vld [vmem:[#allocation2 + $0x300] ss:$0 sm:$0xff] }
 0x3b0   :  { %2394 = vmatpush3.bf16.msra.mxu0 %v2393_v50  ;;  %v1514_v50 = vld [vmem:[#allocation2 + $0x2b0] sm:$0xff] }
 0x3b1   :  { %2395 = vmatprep.subr.bf16.mxu0 %v2551_v24  ;;  %v2450_v52 = vpack.c.bf16 %v1514_v50, %v1513_v49 }
 0x3b4   :  { %2397 = vmatpush3.bf16.msra.mxu0 %v2396_v53  ;;  %v1825_v53 = vld [vmem:[#allocation2 + $0x1d8] ss:$0 sm:$0xff] }
 0x3b5   :  { %2398 = vmatprep.subr.bf16.mxu0 %v2551_v24 }
 0x3b8   :  { %2400 = vmatpush3.bf16.msra.mxu0 %v2399_v56 }
 0x3b9   :  { %2401 = vmatprep.subr.bf16.mxu0 %v2551_v24 }
 0x3bc   :  { %2403 = vmatpush3.bf16.msra.mxu0 %v2402_v59 }
 0x3bd   :  { %2404 = vmatprep.subr.bf16.mxu0 %v2551_v24 }
 0x3c0   :  { %2406 = vmatpush3.bf16.msra.mxu0 %v2405_v62  ;;  %v1829_v62 = vld [vmem:[#allocation2 + $0x228] ss:$0 sm:$0xff] }
 0x3c1   :  { %2407 = vmatprep.subr.bf16.mxu0 %v2551_v24 }
 0x3c4   :  { %2409 = vmatpush3.bf16.msra.mxu0 %v2408_v1 }
 0x3c5   :  { %2440 = vmatprep.subr.bf16.mxu0 %v2551_v24 }
 0x47a   :  { %v1069_v5 = vpop.f32.mrb[14].mxu0 }
 0x47b   :  { %v2155_v6 = vpop.f32.mrb[15].mxu0  ;;  %2189 = vmatmul.mubr.f32.vlgmr.msra.gmra.mrb[16].mxu0 %v1069_v5 }
 0x47c   :  { %2259 = vmatprep.mubr.msk.f32.mxu0 %vm2552_vm3, %v2553_v25  ;;  %2442 = vmatpush3.bf16.msra.mxu0 %v2441_v34  ;;  %v2471_v34 = vpack.c.bf16 %v1694_v33, %v1693_v32 }
 0x47d   :  { %2443 = vmatprep.subr.bf16.mxu0 %v2551_v24 }
 0x480   :  { %2445 = vmatpush3.bf16.msra.mxu0 %v2444_v40 }
 0x481   :  { %2446 = vmatprep.subr.bf16.mxu0 %v2551_v24 }
 0x484   :  { %2448 = vmatpush3.bf16.msra.mxu0 %v2447_v46 }
 0x485   :  { %2449 = vmatprep.subr.bf16.mxu0 %v2551_v24 }
 0x488   :  { %2451 = vmatpush3.bf16.msra.mxu0 %v2450_v52 }
 0x489   :  { %2464 = vmatprep.subr.bf16.mxu0 %v2551_v24 }
 0x54e   :  { %v1160_v14 = vpop.f32.mrb[16].mxu0 }
 0x54f   :  { %v1161_v15 = vadd.f32 %v1824_v11, %v1160_v14  ;;  %v2190_v16 = vpop.f32.mrb[17].mxu0  ;;  %v1590_v11 = vld [vmem:[#allocation2 + $0x2c0] sm:$0xff] }
 0x551   :  { %v1164_v18 = vmax.f32 %v1161_v15, 0.0  ;;  %v2453_v15 = vpack.c.bf16 %v1591_v12, %v1590_v11 }
 0x553   :  { %2200 = vmatmul.mubr.msk.f32.vlgmr.msra.gmra.mrb[10].mxu1 %vm308_vm1, %v1164_v18 }
 0x554   :  { %2418 = vmatpush3.bf16.msra.mxu1 %v2417_v17  ;;  %2210 = vmatprep.mubr.msk.f32.mxu1 %vm2552_vm3, %v2553_v25  ;;  %v1592_v17 = vld [vmem:[#allocation2 + $0x2d0] sm:$0xff] }
 0x555   :  { %2419 = vmatprep.subr.bf16.mxu1 %v2551_v24 }
 0x558   :  { %2421 = vmatpush3.bf16.msra.mxu1 %v2420_v20  ;;  %v1595_v20 = vld [vmem:[#allocation2 + $0x2e8] sm:$0xff] }
 0x559   :  { %2422 = vmatprep.subr.bf16.mxu1 %v2551_v24  ;;  %v2459_v21 = vpack.c.bf16 %v1595_v20, %v1594_v19 }
 0x55b   :  { %2211 = vmatmul.mubr.msk.f32.vlgmr.msra.gmra.mrb[12].mxu1 %vm308_vm1, %v1164_v18 }
 0x55c   :  { %2424 = vmatpush3.bf16.msra.mxu1 %v2423_v23  ;;  %2221 = vmatprep.mubr.msk.f32.mxu1 %vm2552_vm3, %v2553_v25  ;;  %v1597_v23 = vld [vmem:[#allocation2 + $0x2f8] sm:$0xff] }
 0x55d   :  { %2425 = vmatprep.subr.bf16.mxu1 %v2551_v24  ;;  %v2462_v26 = vpack.c.bf16 %v1597_v23, %v1596_v22 }
 0x560   :  { %2427 = vmatpush3.bf16.msra.mxu1 %v2426_v28  ;;  %v1690_v28 = vld [vmem:[#allocation2 + $0x310] sm:$0xff] }
 0x561   :  { %2428 = vmatprep.subr.bf16.mxu1 %v2551_v24  ;;  %v2465_v29 = vpack.c.bf16 %v1690_v28, %v1689_v27 }
 0x563   :  { %2222 = vmatmul.mubr.msk.f32.vlgmr.msra.gmra.mrb[14].mxu1 %vm308_vm1, %v1164_v18  ;;  %v1593_v18 = vld [vmem:[#allocation2 + $0x2d8] sm:$0xff] }
 0x564   :  { %2240 = vmatprep.mubr.msk.f32.mxu1 %vm2552_vm3, %v2553_v25  ;;  %2430 = vmatpush3.bf16.msra.mxu1 %v2429_v31  ;;  %v2456_v7 = vpack.c.bf16 %v1593_v18, %v1592_v17 }
 0x565   :  { %2431 = vmatprep.subr.bf16.mxu1 %v2551_v24 }
 0x568   :  { %2433 = vmatpush3.bf16.msra.mxu1 %v2432_v37  ;;  %v2474_v37 = vpack.c.bf16 %v1696_v36, %v1695_v35 }
 0x569   :  { %2434 = vmatprep.subr.bf16.mxu1 %v2551_v24 }
 0x56c   :  { %2436 = vmatpush3.bf16.msra.mxu1 %v2435_v44 }
 0x56d   :  { %2437 = vmatprep.subr.bf16.mxu1 %v2551_v24 }
 0x570   :  { %2439 = vmatpush3.bf16.msra.mxu1 %v2438_v51 }
 0x571   :  { %2452 = vmatprep.subr.bf16.mxu1 %v2551_v24 }
 0x626   :  { %v1243_v54 = vpop.f32.mrb[10].mxu1 }
 0x627   :  { %v1244_v55 = vadd.f32 %v1825_v53, %v1243_v54  ;;  %v2201_v56 = vpop.f32.mrb[11].mxu1 }
 0x629   :  { %v1832_v57 = vmul.f32 -1.442695, %v1244_v55 }
 0x62b   :  { %2500 = vpow2.f32 %v1832_v57 }
 0x62e   :  { %v1322_v58 = vpop.f32.mrb[12].mxu1 }
 0x62f   :  { %v2212_v59 = vpop.f32.mrb[13].mxu1  ;;  %v1323_v61 = vadd.f32 %v1827_v60, %v1322_v58 }
 0x631   :  { %2502 = vtanh.f32 %v1323_v61  ;;  %v1841_v61 = vld [vmem:[#allocation2 + $0x348] ss:$0 sm:$0xff] }
 0x635   :  { %v2501_v63 = vpop.eup %2500 }
 0x636   :  { %v1414_v0 = vadd.f32 1.0, %v2501_v63  ;;  %v1401_v1 = vpop.f32.mrb[14].mxu1 }
 0x637   :  { %v1402_v2 = vadd.f32 %v1829_v62, %v1401_v1  ;;  %v2223_v3 = vpop.f32.mrb[15].mxu1 }
 0x638   :  { %2504 = vrcp.f32 %v1414_v0 }
 0x639   :  { %v1831_v4 = vmul.f32 -1.442695, %v1402_v2 }
 0x63b   :  { %2506 = vpow2.f32 %v1831_v4  ;;  %v2503_v5 = vpop.eup %2502 }
 0x642   :  { %v2505_v6 = vpop.eup %2504 }
 0x643   :  { %v1418_v8 = vmul.f32 %v2505_v6, %v2503_v5 }
 0x645   :  { %v2507_v9 = vpop.eup %2506  ;;  %2508 = vtanh.f32 %v1418_v8 }
 0x646   :  { %v1408_v10 = vadd.f32 1.0, %v2507_v9 }
 0x648   :  { %2510 = vrcp.f32 %v1408_v10 }
 0x64f   :  { %v2509_v13 = vpop.eup %2508 }
 0x652   :  { %v2511_v14 = vpop.eup %2510 }
 0x653   :  { %v1420_v16 = vmul.f32 %v2511_v14, %v2509_v13 }
 0x655   :  { %2241 = vmatmul.mubr.msk.f32.vlgmr.msra.gmra.mrb[16].mxu1 %vm528_vm2, %v1420_v16  ;;  %2260 = vmatmul.mubr.msk.f32.vlgmr.msra.gmra.mrb[18].mxu0 %vm528_vm2, %v1420_v16 }
 0x656   :  { %2454 = vmatpush3.bf16.msra.mxu1 %v2453_v15  ;;  %2278 = vmatprep.mubr.msk.f32.mxu1 %vm2552_vm3, %v2553_v25 }
 0x657   :  { %2455 = vmatprep.subr.bf16.mxu1 %v2551_v24  ;;  %2297 = vmatprep.mubr.msk.f32.mxu0 %vm2552_vm3, %v2553_v25  ;;  %v1691_v25 = vld [vmem:[#allocation2 + $0x318] sm:$0xff] }
 0x658   :  { %2466 = vmatpush3.bf16.msra.mxu0 %v2465_v29  ;;  %v2468_v31 = vpack.c.bf16 %v1692_v30, %v1691_v25 }
 0x659   :  { %2467 = vmatprep.subr.bf16.mxu0 %v2551_v24 }
 0x65a   :  { %2457 = vmatpush3.bf16.msra.mxu1 %v2456_v7 }
 0x65b   :  { %2458 = vmatprep.subr.bf16.mxu1 %v2551_v24 }
 0x65c   :  { %2469 = vmatpush3.bf16.msra.mxu0 %v2468_v31 }
 0x65d   :  { %2470 = vmatprep.subr.bf16.mxu0 %v2551_v24 }
 0x65e   :  { %2460 = vmatpush3.bf16.msra.mxu1 %v2459_v21 }
 0x65f   :  { %2461 = vmatprep.subr.bf16.mxu1 %v2551_v24 }
 0x660   :  { %2472 = vmatpush3.bf16.msra.mxu0 %v2471_v34 }
 0x661   :  { %2473 = vmatprep.subr.bf16.mxu0 %v2551_v24 }
 0x662   :  { %2463 = vmatpush3.bf16.msra.mxu1 %v2462_v26 }
 0x664   :  { %2475 = vmatpush3.bf16.msra.mxu0 %v2474_v37 }
 0x665   :  { %2279 = vmatmul.mubr.msk.f32.vlgmr.msra.gmra.mrb[18].mxu1 %vm528_vm2, %v1420_v16 }
 0x728   :  { %v1503_v39 = vpop.f32.mrb[16].mxu1  ;;  %v1586_v40 = vpop.f32.mrb[18].mxu0 }
 0x729   :  { %v1504_v41 = vadd.f32 %v1833_v38, %v1503_v39  ;;  %v2242_v42 = vpop.f32.mrb[17].mxu1  ;;  %v2261_v43 = vpop.f32.mrb[19].mxu0  ;;  %v1587_v46 = vadd.f32 %v1835_v45, %v1586_v40 }
 0x72b   :  { %v1840_v44 = vmul.f32 -1.442695, %v1504_v41 }
 0x72d   :  { %2512 = vpow2.f32 %v1840_v44 }
 0x72e   :  { %2514 = vtanh.f32 %v1587_v46 }
 0x737   :  { %v2513_v48 = vpop.eup %2512 }
 0x738   :  { %v1682_v49 = vadd.f32 1.0, %v2513_v48  ;;  %v1669_v50 = vpop.f32.mrb[18].mxu1  ;;  %v2515_v53 = vpop.eup %2514 }
 0x739   :  { %v1670_v51 = vadd.f32 %v1837_v47, %v1669_v50  ;;  %v2280_v52 = vpop.f32.mrb[19].mxu1 }
 0x73a   :  { %2516 = vrcp.f32 %v1682_v49 }
 0x73b   :  { %v1839_v24 = vmul.f32 -1.442695, %v1670_v51 }
 0x73d   :  { %2518 = vpow2.f32 %v1839_v24 }
 0x744   :  { %v2517_v54 = vpop.eup %2516 }
 0x745   :  { %v1686_v55 = vmul.f32 %v2517_v54, %v2515_v53 }
 0x747   :  { %v2519_v56 = vpop.eup %2518  ;;  %2520 = vtanh.f32 %v1686_v55 }
 0x748   :  { %v1676_v57 = vadd.f32 1.0, %v2519_v56 }
 0x74a   :  { %2522 = vrcp.f32 %v1676_v57 }
 0x751   :  { %v2521_v58 = vpop.eup %2520 }
 0x754   :  { %v2523_v59 = vpop.eup %2522 }
 0x755   :  { %v1688_v60 = vmul.f32 %v2523_v59, %v2521_v58 }
 0x757   :  { %2298 = vmatmul.mubr.msk.f32.vlgmr.msra.gmra.mrb[20].mxu0 %vm528_vm2, %v1688_v60 }
 0x82a   :  { %v1771_v62 = vpop.f32.mrb[20].mxu0 }
 0x82b   :  { %v1772_v63 = vadd.f32 %v1841_v61, %v1771_v62  ;;  %v2299_v0 = vpop.f32.mrb[21].mxu0 }
 0x82d   :  { %1775 = vst [vmem:[%s2728_s2] sm:$0xff] %v1772_v63 }
 0x82e   :  { %1780 = vsyncpa [#allocation3], 1 }

</bundles_post_ra>
